<compile_context>
chip_gen: v6e
topology: v6e:2x2x1
jax: 0.10.0
libtpu: 0.0.40
codegen_flags: <defaults>
</compile_context>

<pallas_src>
import functools

import numpy as np
import jax
import jax.numpy as jnp
from jax.experimental import pallas as pl
from jax.experimental.pallas import tpu as pltpu

# ----------------------------------------------------------------------------
# Synthetic model configuration (scaled-down SAM2)
# ----------------------------------------------------------------------------
HIDDEN = 32           # stand-in for SAM2 transformer_dim (real: 256)
N_SEG_QUERIES = 2     # Q
N_TOKEN_DIMS = 32     # LLM token dim feeding proj_token
IMG_SIZE = 64         # stand-in for SAM2 img_size = 1024
FEAT_G = 4            # backbone_fpn[2] grid (IMG_SIZE // 16)
HR1_G = 8             # backbone_fpn[1] grid
HR0_G = 16            # backbone_fpn[0] grid

VMEM_LIMIT = 32 * 1024 * 1024   # explicit scoped-VMEM limit; safe on v5e/v6e/v7x


# ----------------------------------------------------------------------------
# Generic tiled linear (used for patch projections / proj_token)
# ----------------------------------------------------------------------------
def _linear_kernel(x_ref, w_ref, b_ref, o_ref, *, act):
    acc = jnp.dot(x_ref[...], w_ref[...], preferred_element_type=jnp.float32)
    acc = acc + b_ref[...].astype(jnp.float32)
    if act == "relu":
        acc = jnp.maximum(acc, 0.0)
    elif act == "gelu":
        acc = jax.nn.gelu(acc, approximate=True)
    o_ref[...] = acc.astype(o_ref.dtype)


def pallas_linear(x, w, b=None, act="none", out_dtype=None, tm=256):
    """Y = act(X @ W + b), X:[M,K], W:[K,N]; grid-tiled over M (K kept whole —
    at real SAM2 scale K would also be tiled with an f32 accumulator)."""
    M, K = x.shape
    K2, N = w.shape
    assert K == K2
    if b is None:
        b = jnp.zeros((N,), w.dtype)
    b2 = jnp.reshape(b, (1, N))
    out_dtype = out_dtype or x.dtype
    if M <= tm:
        bm, grid = M, (1,)
    else:
        bm, grid = tm, (pl.cdiv(M, tm),)       # tm is a multiple of 8
    bytes_io = int(M * K * x.dtype.itemsize + K * N * w.dtype.itemsize
                   + M * N * jnp.dtype(out_dtype).itemsize)
    return pl.pallas_call(
        functools.partial(_linear_kernel, act=act),
        out_shape=jax.ShapeDtypeStruct((M, N), out_dtype),
        grid=grid,
        in_specs=[
            pl.BlockSpec((bm, K), lambda i: (i, 0)),
            pl.BlockSpec((K, N), lambda i: (0, 0)),
            pl.BlockSpec((1, N), lambda i: (0, 0)),
        ],
        out_specs=pl.BlockSpec((bm, N), lambda i: (i, 0)),
        compiler_params=pltpu.CompilerParams(
            dimension_semantics=("parallel",),
            vmem_limit_bytes=VMEM_LIMIT),
        cost_estimate=pl.CostEstimate(flops=2 * M * K * N, transcendentals=0,
                                      bytes_accessed=bytes_io),
    )(x, w, b2)


# ----------------------------------------------------------------------------
# Frame normalization: (x - mean) / std with mean/std baked as constants
# ----------------------------------------------------------------------------
def _normalize_kernel(x_ref, o_ref, *, mean, inv_std):
    x = x_ref[0].astype(jnp.float32)                       # [C, H*W]
    c = x.shape[0]
    row = jax.lax.broadcasted_iota(jnp.int32, (c, 1), 0)   # channel index per sublane
    m = jnp.where(row == 0, mean[0], jnp.where(row == 1, mean[1], mean[2]))
    s = jnp.where(row == 0, inv_std[0], jnp.where(row == 1, inv_std[1], inv_std[2]))
    o_ref[0] = ((x - m) * s).astype(o_ref.dtype)


def pallas_normalize(frames, mean, std, out_dtype):
    """frames: [T, 3, H, W] float32 in [0,1] -> normalized (out_dtype)."""
    T, C, H, W = frames.shape
    x3 = frames.reshape(T, C, H * W)
    out = pl.pallas_call(
        functools.partial(_normalize_kernel,
                          mean=tuple(float(v) for v in mean),
                          inv_std=tuple(1.0 / float(v) for v in std)),
        out_shape=jax.ShapeDtypeStruct((T, C, H * W), out_dtype),
        grid=(T,),
        in_specs=[pl.BlockSpec((1, C, H * W), lambda t: (t, 0, 0))],
        out_specs=pl.BlockSpec((1, C, H * W), lambda t: (t, 0, 0)),
        compiler_params=pltpu.CompilerParams(
            dimension_semantics=("parallel",),
            vmem_limit_bytes=VMEM_LIMIT),
    )(x3)
    return out.reshape(T, C, H, W)


# ----------------------------------------------------------------------------
# 1x1 conv, channels-last input [T, S, C] -> channels-first output [T, Cout, S]
# (spatial on the lane axis downstream — lane-dense and no XLA transpose glue)
# ----------------------------------------------------------------------------
def _conv_cf_kernel(x_ref, w_ref, b_ref, o_ref):
    x = x_ref[0].astype(jnp.float32)                       # [S, C]
    w = w_ref[...].astype(jnp.float32)                     # [C, Cout]
    y = jax.lax.dot_general(w, x, (((0,), (1,)), ((), ())),
                            preferred_element_type=jnp.float32)   # [Cout, S]
    y = y + b_ref[...].astype(jnp.float32)                 # [Cout, 1] broadcast
    o_ref[0] = y.astype(o_ref.dtype)


def pallas_conv1x1_cf(x_cl, w, b, out_dtype):
    T, S, C = x_cl.shape
    Cout = w.shape[1]
    return pl.pallas_call(
        _conv_cf_kernel,
        out_shape=jax.ShapeDtypeStruct((T, Cout, S), out_dtype),
        grid=(T,),
        in_specs=[pl.BlockSpec((1, S, C), lambda t: (t, 0, 0)),
                  pl.BlockSpec((C, Cout), lambda t: (0, 0)),
                  pl.BlockSpec((Cout, 1), lambda t: (0, 0))],
        out_specs=pl.BlockSpec((1, Cout, S), lambda t: (t, 0, 0)),
        compiler_params=pltpu.CompilerParams(
            dimension_semantics=("parallel",),
            vmem_limit_bytes=VMEM_LIMIT),
    )(x_cl, w, b.reshape(Cout, 1))


# ----------------------------------------------------------------------------
# Fused per-video mask decoder: one pallas_call, grid over frames
# ----------------------------------------------------------------------------
def _decoder_kernel(tok_ref, src_ref, hr0_ref, hr1_ref, pe_ref, addc_ref,
                    wq_ref, wk_ref, wv_ref,
                    up1w_ref, up1b_ref, up2w_ref, up2b_ref,
                    h1w_ref, h1b_ref, h2w_ref, h2b_ref,
                    r1_ref, r2_ref, o_ref, *, scale):
    f32 = jnp.float32
    tok = tok_ref[...].astype(f32)                                   # [Nq, C]
    src = src_ref[0].astype(f32) + addc_ref[...]                     # [G2, C]  (+ no_mem + no_mask)
    pe = pe_ref[...].astype(f32)                                     # [G2, C]

    # ---- single-head token->image cross attention with residual (f32 softmax) ----
    q = jnp.dot(tok, wq_ref[...].astype(f32), preferred_element_type=f32)        # [Nq, C]
    k = jnp.dot(src + pe, wk_ref[...].astype(f32), preferred_element_type=f32)   # [G2, C]
    v = jnp.dot(src, wv_ref[...].astype(f32), preferred_element_type=f32)        # [G2, C]
    s = jax.lax.dot_general(q, k, (((1,), (1,)), ((), ())),
                            preferred_element_type=f32) * scale                  # [Nq, G2]
    s = s - jnp.max(s, axis=-1, keepdims=True)
    e = jnp.exp(s)
    p = e * pl.reciprocal(jnp.sum(e, axis=-1, keepdims=True), approx=True)
    tok = tok + jnp.dot(p, v, preferred_element_type=f32)                         # [Nq, C]

    # ---- 4x output upscaling (channels-first, spatial on the lane axis) ----
    # conv1x1 / GELU commute exactly with the nearest-2x upsample, so apply them on
    # the small pre-upsample tensor and do the upsample as a constant 0/1 matmul.
    y1 = jax.lax.dot_general(up1w_ref[...].astype(f32), src,
                             (((0,), (1,)), ((), ())), preferred_element_type=f32)  # [C/4, G2]
    y1 = jax.nn.gelu(y1 + up1b_ref[...].astype(f32), approximate=True)
    u1 = jnp.dot(y1, r1_ref[...], preferred_element_type=f32) + hr1_ref[0].astype(f32)  # [C/4, 4G2]

    y2 = jax.lax.dot_general(up2w_ref[...].astype(f32), u1,
                             (((0,), (0,)), ((), ())), preferred_element_type=f32)  # [C/8, 4G2]
    y2 = jax.nn.gelu(y2 + up2b_ref[...].astype(f32), approximate=True)
    up = jnp.dot(y2, r2_ref[...], preferred_element_type=f32) + hr0_ref[0].astype(f32)  # [C/8, 16G2]

    # ---- hypernetwork MLP -> per-prompt mask weights, dot with upscaled embedding ----
    h = jnp.maximum(jnp.dot(tok, h1w_ref[...].astype(f32), preferred_element_type=f32)
                    + h1b_ref[...].astype(f32), 0.0)
    wh = (jnp.dot(h, h2w_ref[...].astype(f32), preferred_element_type=f32)
          + h2b_ref[...].astype(f32))                                   # [Nq, C/8]
    masks = jnp.dot(wh, up, preferred_element_type=f32)                 # [Nq, 16G2] lane-dense
    o_ref[0] = masks.astype(o_ref.dtype)


def _nearest2x_matrix(g):
    """Flattened nearest-neighbor 2x upsample as a constant matrix [g*g, (2g)*(2g)]."""
    r = np.zeros((g * g, 4 * g * g), np.float32)
    for ry in range(2 * g):
        for rx in range(2 * g):
            r[(ry // 2) * g + (rx // 2), ry * (2 * g) + rx] = 1.0
    return jnp.asarray(r)


def pallas_mask_decoder(tokens, backbone_cl, hr0_cf, hr1_cf, p):
    """tokens:[Nq,C] f32, backbone_cl:[T,G2,C], hr0_cf:[T,C/8,256], hr1_cf:[T,C/4,64]
    -> low-res mask logits [T, Nq, 256] (f32).  multimask_output=False path."""
    T, G2, C = backbone_cl.shape
    Nq = tokens.shape[0]
    C8, S0 = hr0_cf.shape[1], hr0_cf.shape[2]
    C4, S1 = hr1_cf.shape[1], hr1_cf.shape[2]

    pe_cl = jnp.transpose(p["image_pe"].reshape(C, G2)).astype(jnp.float32)      # [G2, C]
    addc = (p["no_mem_embed"].reshape(1, C).astype(jnp.float32)
            + p["no_mask_embed"].reshape(1, C).astype(jnp.float32))              # no_mem + dense embed
    r1 = _nearest2x_matrix(FEAT_G)            # [16, 64]
    r2 = _nearest2x_matrix(2 * FEAT_G)        # [64, 256]

    full = lambda t: (0, 0)
    per_t = lambda t: (t, 0, 0)

    in_specs = [
        pl.BlockSpec((Nq, C), full),              # tokens (sparse prompt embeddings)
        pl.BlockSpec((1, G2, C), per_t),          # backbone frame
        pl.BlockSpec((1, C8, S0), per_t),         # hr0 (conv_s0 features)
        pl.BlockSpec((1, C4, S1), per_t),         # hr1 (conv_s1 features)
        pl.BlockSpec((G2, C), full),              # image_pe
        pl.BlockSpec((1, C), full),               # no_mem + no_mask per-channel add
        pl.BlockSpec((C, C), full),               # wq
        pl.BlockSpec((C, C), full),               # wk
        pl.BlockSpec((C, C), full),               # wv
        pl.BlockSpec((C, C4), full),              # up1_w
        pl.BlockSpec((C4, 1), full),              # up1_b
        pl.BlockSpec((C4, C8), full),             # up2_w
        pl.BlockSpec((C8, 1), full),              # up2_b
        pl.BlockSpec((C, C), full),               # hyper1_w
        pl.BlockSpec((1, C), full),               # hyper1_b
        pl.BlockSpec((C, C8), full),              # hyper2_w
        pl.BlockSpec((1, C8), full),              # hyper2_b
        pl.BlockSpec((G2, 4 * G2), full),         # nearest-2x matrix (stage 1)
        pl.BlockSpec((4 * G2, 16 * G2), full),    # nearest-2x matrix (stage 2)
    ]
    return pl.pallas_call(
        functools.partial(_decoder_kernel, scale=1.0 / float(np.sqrt(C))),
        out_shape=jax.ShapeDtypeStruct((T, Nq, S0), jnp.float32),
        grid=(T,),
        in_specs=in_specs,
        out_specs=pl.BlockSpec((1, Nq, S0), per_t),
        compiler_params=pltpu.CompilerParams(
            dimension_semantics=("parallel",),
            vmem_limit_bytes=VMEM_LIMIT),
    )(tokens, backbone_cl, hr0_cf, hr1_cf, pe_cl, addc,
      p["wq"], p["wk"], p["wv"],
      p["up1_w"], p["up1_b"].reshape(C4, 1), p["up2_w"], p["up2_b"].reshape(C8, 1),
      p["hyper1_w"], p["hyper1_b"].reshape(1, C), p["hyper2_w"], p["hyper2_b"].reshape(1, C8),
      r1, r2)


# ----------------------------------------------------------------------------
# Postprocess: composed (resize-to-1024 -> crop -> resize-to-orig) + max over Q
# ----------------------------------------------------------------------------
def _bilinear_matrix_np(out_size, in_size):
    """F.interpolate(mode='bilinear', align_corners=False) along one axis, as a matrix."""
    i = np.arange(out_size, dtype=np.float64)
    src = (i + 0.5) * (in_size / out_size) - 0.5
    src = np.maximum(src, 0.0)
    i0 = np.floor(src).astype(np.int64)
    frac = src - i0
    i0c = np.clip(i0, 0, in_size - 1)
    i1c = np.clip(i0 + 1, 0, in_size - 1)
    a = np.zeros((out_size, in_size), np.float64)
    a[np.arange(out_size), i0c] += (1.0 - frac)
    a[np.arange(out_size), i1c] += frac
    return a


def _composed_resize_matrices(meta, resize_to_original_dims, low_res_size):
    """Compose lowres->IMG_SIZE bilinear, crop (un-pad), and ->orig bilinear per axis."""
    left, right, top, bottom = meta["padding"]
    a1h = _bilinear_matrix_np(IMG_SIZE, low_res_size)[top:IMG_SIZE - bottom, :]
    a1w = _bilinear_matrix_np(IMG_SIZE, low_res_size)[left:IMG_SIZE - right, :]
    rh, rw = meta["resized_image_size"]
    assert a1h.shape[0] == rh and a1w.shape[0] == rw, \
        (a1h.shape, a1w.shape, meta["resized_image_size"])
    if resize_to_original_dims:
        oh, ow = meta["orig_image_size"]
        ah = _bilinear_matrix_np(oh, rh) @ a1h
        aw = _bilinear_matrix_np(ow, rw) @ a1w
    else:
        ah, aw = a1h, a1w
    return jnp.asarray(ah, jnp.float32), jnp.asarray(aw, jnp.float32)


def _postproc_kernel(m_ref, ah_ref, aw_ref, o_ref, *, n_obj, n_q):
    x = m_ref[0].astype(jnp.float32)          # [Nq, h, w] low-res logits for this frame
    ah = ah_ref[...]                          # [OH, h]
    aw = aw_ref[...]                          # [OW, w]
    for m in range(n_obj):
        best = None
        for qi in range(n_q):
            xq = x[m * n_q + qi]                                              # [h, w]
            tmp = jnp.dot(ah, xq, preferred_element_type=jnp.float32)         # [OH, w]
            r = jax.lax.dot_general(tmp, aw, (((1,), (1,)), ((), ())),
                                    preferred_element_type=jnp.float32)       # [OH, OW]
            best = r if best is None else jnp.maximum(best, r)
        o_ref[m, 0] = best.astype(o_ref.dtype)   # max over Q taken AFTER resize (matches ref)


def pallas_postprocess_max(low_res, ah, aw, n_q):
    """low_res:[T, Nq, h, w] -> [Nq//Q, T, OH, OW]; resize+crop+resize (composed) then Q-max."""
    T, Nq, h, w = low_res.shape
    n_obj = Nq // n_q
    OH, OW = ah.shape[0], aw.shape[0]
    return pl.pallas_call(
        functools.partial(_postproc_kernel, n_obj=n_obj, n_q=n_q),
        out_shape=jax.ShapeDtypeStruct((n_obj, T, OH, OW), jnp.float32),
        grid=(T,),
        in_specs=[pl.BlockSpec((1, Nq, h, w), lambda t: (t, 0, 0, 0)),
                  pl.BlockSpec((OH, h), lambda t: (0, 0)),
                  pl.BlockSpec((OW, w), lambda t: (0, 0))],
        out_specs=pl.BlockSpec((n_obj, 1, OH, OW), lambda t: (0, t, 0, 0)),
        compiler_params=pltpu.CompilerParams(
            dimension_semantics=("parallel",),
            vmem_limit_bytes=VMEM_LIMIT),
    )(low_res, ah, aw)


# ----------------------------------------------------------------------------
# Synthetic image encoder (glue = layout plumbing; compute = Pallas)
# ----------------------------------------------------------------------------
def _patchify(x, patch):
    """NCHW -> [T*g*g, 3*patch*patch] (non-overlapping patches, channel-major)."""
    T, C, H, W = x.shape
    g = H // patch
    x = x.reshape(T, C, g, patch, g, patch)
    x = jnp.transpose(x, (0, 2, 4, 1, 3, 5))          # [T, g, g, C, p, p]
    return x.reshape(T * g * g, C * patch * patch), g


def patchify_project_cl(x, patch, w, b):
    """-> channels-last features [T, g*g, HIDDEN]."""
    flat, g = _patchify(x, patch)
    out = pallas_linear(flat, w, b, out_dtype=jnp.bfloat16)   # batched over ALL frames
    return out.reshape(x.shape[0], g * g, HIDDEN)


# ----------------------------------------------------------------------------
# Full forward (mirrors SegmentationHeadSAM2.forward)
# ----------------------------------------------------------------------------
def segmentation_head_forward(params, video_frames, seg_tokens, seg_meta,
                              resize_to_original_dims=True):
    # TODO(synk): bucket (T, M, orig_size) combinations to avoid per-shape recompiles.
    clip_lens = [int(v.shape[0]) for v in video_frames]
    n_objs = [int(t.shape[0]) for t in seg_tokens]

    # ---- image encoder: all videos' frames batched into one set of kernels ----
    frames_all = jnp.concatenate(video_frames, axis=0)          # [T_total, 3, IMG, IMG]
    x = pallas_normalize(frames_all, params["image_mean"], params["image_std"], jnp.bfloat16)

    # TODO(synk): pretrained SAM2 Hiera encoder+FPN replaced by synthetic patchify projections.
    fpn0_cl = patchify_project_cl(x, IMG_SIZE // HR0_G, params["patch0_w"], params["patch0_b"])
    fpn1_cl = patchify_project_cl(x, IMG_SIZE // HR1_G, params["patch1_w"], params["patch1_b"])
    fpn2_cl = patchify_project_cl(x, IMG_SIZE // FEAT_G, params["patch2_w"], params["patch2_b"])
    # mask_decoder.conv_s0 / conv_s1 -> channels-first high-res features
    hr0_cf = pallas_conv1x1_cf(fpn0_cl, params["conv_s0_w"], params["conv_s0_b"], jnp.bfloat16)
    hr1_cf = pallas_conv1x1_cf(fpn1_cl, params["conv_s1_w"], params["conv_s1_b"], jnp.bfloat16)
    # (no_mem_embed + dense no_mask_embed are per-channel adds, folded into the decoder kernel)

    # ---- proj_token over all videos at once: Linear(n_token_dims, hidden*Q), 'M (Q C)->(M Q) C'
    all_tok = jnp.concatenate(seg_tokens, axis=0)
    proj = pallas_linear(all_tok, params["proj_token_w"], params["proj_token_b"],
                         out_dtype=jnp.float32)
    proj = proj.reshape(-1, HIDDEN)                              # [(M_total * Q), HIDDEN]

    t_off = np.cumsum([0] + clip_lens)
    q_off = np.cumsum([0] + [m * N_SEG_QUERIES for m in n_objs])

    outputs = []
    for vi in range(len(video_frames)):
        t0, t1 = int(t_off[vi]), int(t_off[vi + 1])
        o0, o1 = int(q_off[vi]), int(q_off[vi + 1])
        tokens_v = proj[o0:o1]                                   # [M_v * Q, HIDDEN]

        # fused TwoWayTransformer-stand-in mask decoder over all frames of this video
        low_res = pallas_mask_decoder(tokens_v, fpn2_cl[t0:t1], hr0_cf[t0:t1],
                                      hr1_cf[t0:t1], params)     # [T_v, Nq, 256]
        T_v, Nq, _ = low_res.shape
        low = low_res.reshape(T_v, Nq, 4 * FEAT_G, 4 * FEAT_G)

        ah, aw = _composed_resize_matrices(seg_meta[vi], resize_to_original_dims, 4 * FEAT_G)
        out_v = pallas_postprocess_max(low, ah, aw, N_SEG_QUERIES)   # [M_v, T_v, OH, OW]
        outputs.append(out_v)
    return outputs


# ----------------------------------------------------------------------------
# Deterministic parameter initialization (synthetic weights, no checkpoint load)
# ----------------------------------------------------------------------------
def init_params(key):
    def nrm(k, shape, dtype, scale=0.05):
        return (scale * jax.random.normal(k, shape, jnp.float32)).astype(dtype)

    ks = jax.random.split(key, 16)
    bf = jnp.bfloat16
    p = {
        "proj_token_w": nrm(ks[0], (N_TOKEN_DIMS, HIDDEN * N_SEG_QUERIES), jnp.float32),
        "proj_token_b": jnp.zeros((HIDDEN * N_SEG_QUERIES,), jnp.float32),
        "patch0_w": nrm(ks[1], (3 * (IMG_SIZE // HR0_G) ** 2, HIDDEN), bf),
        "patch0_b": jnp.zeros((HIDDEN,), bf),
        "patch1_w": nrm(ks[2], (3 * (IMG_SIZE // HR1_G) ** 2, HIDDEN), bf),
        "patch1_b": jnp.zeros((HIDDEN,), bf),
        "patch2_w": nrm(ks[3], (3 * (IMG_SIZE // FEAT_G) ** 2, HIDDEN), bf),
        "patch2_b": jnp.zeros((HIDDEN,), bf),
        "no_mem_embed": nrm(ks[4], (1, HIDDEN, 1, 1), bf),
        "no_mask_embed": nrm(ks[5], (HIDDEN,), bf),
        "image_pe": nrm(ks[6], (HIDDEN, FEAT_G, FEAT_G), bf),
        "conv_s0_w": nrm(ks[7], (HIDDEN, HIDDEN // 8), bf),
        "conv_s0_b": jnp.zeros((HIDDEN // 8,), bf),
        "conv_s1_w": nrm(ks[8], (HIDDEN, HIDDEN // 4), bf),
        "conv_s1_b": jnp.zeros((HIDDEN // 4,), bf),
        "wq": nrm(ks[9], (HIDDEN, HIDDEN), bf),
        "wk": nrm(ks[10], (HIDDEN, HIDDEN), bf),
        "wv": nrm(ks[11], (HIDDEN, HIDDEN), bf),
        "up1_w": nrm(ks[12], (HIDDEN, HIDDEN // 4), bf),
        "up1_b": jnp.zeros((HIDDEN // 4,), bf),
        "up2_w": nrm(ks[13], (HIDDEN // 4, HIDDEN // 8), bf),
        "up2_b": jnp.zeros((HIDDEN // 8,), bf),
        "hyper1_w": nrm(ks[14], (HIDDEN, HIDDEN), bf),
        "hyper1_b": jnp.zeros((HIDDEN,), bf),
        "hyper2_w": nrm(ks[15], (HIDDEN, HIDDEN // 8), bf),
        "hyper2_b": jnp.zeros((HIDDEN // 8,), bf),
        "image_mean": (0.485, 0.456, 0.406),   # baked as compile-time constants
        "image_std": (0.229, 0.224, 0.225),
    }
    return p


if __name__ == "__main__":
    key = jax.random.PRNGKey(0)
    pkey, dkey = jax.random.split(key)
    params = init_params(pkey)

    k1, k2, k3, k4 = jax.random.split(dkey, 4)
    # batch of 2 videos; T may differ per video
    video_frames = [
        jax.random.uniform(k1, (2, 3, IMG_SIZE, IMG_SIZE), jnp.float32),
        jax.random.uniform(k2, (1, 3, IMG_SIZE, IMG_SIZE), jnp.float32),
    ]
    # M objects per video, token dim = N_TOKEN_DIMS
    seg_tokens = [
        jax.random.normal(k3, (2, N_TOKEN_DIMS), jnp.float32),
        jax.random.normal(k4, (1, N_TOKEN_DIMS), jnp.float32),
    ]
    seg_meta = [
        {"padding": (0, 0, 4, 4), "resized_image_size": (56, 64), "orig_image_size": (48, 48)},
        {"padding": (4, 4, 0, 0), "resized_image_size": (64, 56), "orig_image_size": (40, 48)},
    ]

    outs = segmentation_head_forward(params, video_frames, seg_tokens, seg_meta,
                                     resize_to_original_dims=True)
    for o in outs:
        jax.block_until_ready(o)
    # outs[i] has shape [M_i, T_i, orig_H_i, orig_W_i]
    assert outs[0].shape == (2, 2, 48, 48), outs[0].shape
    assert outs[1].shape == (1, 1, 40, 48), outs[1].shape
    print("KERNEL_OK")
</pallas_src>

<mosaic_0001>
module attributes {stable_mosaic.version = 11 : i64} {
  func.func @_normalize_kernel(%arg0: i32, %arg1: memref<1x3x4096xf32, #tpu.memory_space<vmem>>, %arg2: memref<1x3x4096xbf16, #tpu.memory_space<vmem>>) attributes {dimension_semantics = [#tpu.dimension_semantics<parallel>], iteration_bounds = array<i64: 3>, scalar_prefetch = 0 : i64, scratch_operands = 0 : i64, tpu.core_type = #tpu.core_type<tc>, window_params = [{transform_indices = @transform_0, window_bounds = array<i64: 1, 3, 4096>}, {transform_indices = @transform_1, window_bounds = array<i64: 1, 3, 4096>}]} {
    %c0 = arith.constant 0 : index
    %c0_0 = arith.constant 0 : index
    %c0_1 = arith.constant 0 : index
    %0 = vector.load %arg1[%c0, %c0_0, %c0_1] : memref<1x3x4096xf32, #tpu.memory_space<vmem>>, vector<1x3x4096xf32>
    %1 = vector.shape_cast %0 : vector<1x3x4096xf32> to vector<3x4096xf32>
    %2 = tpu.iota {dimensions = array<i32: 0>} : vector<3x1xi32>
    %c0_i32 = arith.constant 0 : i32
    %3 = vector.broadcast %c0_i32 : i32 to vector<3x1xi32>
    %4 = arith.cmpi eq, %2, %3 : vector<3x1xi32>
    %c1_i32 = arith.constant 1 : i32
    %5 = vector.broadcast %c1_i32 : i32 to vector<3x1xi32>
    %6 = arith.cmpi eq, %2, %5 : vector<3x1xi32>
    %cst = arith.constant 4.560000e-01 : f32
    %cst_2 = arith.constant 4.060000e-01 : f32
    %7 = vector.broadcast %cst : f32 to vector<3x1xf32>
    %8 = vector.broadcast %cst_2 : f32 to vector<3x1xf32>
    %9 = arith.select %6, %7, %8 : vector<3x1xi1>, vector<3x1xf32>
    %cst_3 = arith.constant 4.850000e-01 : f32
    %10 = vector.broadcast %cst_3 : f32 to vector<3x1xf32>
    %11 = arith.select %4, %10, %9 : vector<3x1xi1>, vector<3x1xf32>
    %c0_i32_4 = arith.constant 0 : i32
    %12 = vector.broadcast %c0_i32_4 : i32 to vector<3x1xi32>
    %13 = arith.cmpi eq, %2, %12 : vector<3x1xi32>
    %c1_i32_5 = arith.constant 1 : i32
    %14 = vector.broadcast %c1_i32_5 : i32 to vector<3x1xi32>
    %15 = arith.cmpi eq, %2, %14 : vector<3x1xi32>
    %cst_6 = arith.constant 4.46428585 : f32
    %cst_7 = arith.constant 4.44444466 : f32
    %16 = vector.broadcast %cst_6 : f32 to vector<3x1xf32>
    %17 = vector.broadcast %cst_7 : f32 to vector<3x1xf32>
    %18 = arith.select %15, %16, %17 : vector<3x1xi1>, vector<3x1xf32>
    %cst_8 = arith.constant 4.36681223 : f32
    %19 = vector.broadcast %cst_8 : f32 to vector<3x1xf32>
    %20 = arith.select %13, %19, %18 : vector<3x1xi1>, vector<3x1xf32>
    %21 = vector.broadcast %11 : vector<3x1xf32> to vector<3x4096xf32>
    %22 = arith.subf %1, %21 : vector<3x4096xf32>
    %23 = vector.broadcast %20 : vector<3x1xf32> to vector<3x4096xf32>
    %24 = arith.mulf %22, %23 : vector<3x4096xf32>
    %25 = arith.truncf %24 : vector<3x4096xf32> to vector<3x4096xbf16>
    %c0_9 = arith.constant 0 : index
    %c0_10 = arith.constant 0 : index
    %c0_11 = arith.constant 0 : index
    %26 = vector.load %arg2[%c0_9, %c0_10, %c0_11] : memref<1x3x4096xbf16, #tpu.memory_space<vmem>>, vector<1x3x4096xbf16>
    %27 = vector.shape_cast %26 : vector<1x3x4096xbf16> to vector<3x4096xbf16>
    %28 = vector.shape_cast %25 : vector<3x4096xbf16> to vector<1x3x4096xbf16>
    tpu.vector_store %arg2[%c0_9, %c0_10, %c0_11], %28 {strides = array<i32>} : memref<1x3x4096xbf16, #tpu.memory_space<vmem>>, vector<1x3x4096xbf16>,
    return
  }
  func.func @transform_0(%arg0: i32) -> (i32, i32, i32) {
    %c0_i32 = arith.constant 0 : i32
    %c0_i32_0 = arith.constant 0 : i32
    %c0_i32_1 = arith.constant 0 : i32
    return %arg0, %c0_i32, %c0_i32_0 : i32, i32, i32
  }
  func.func @transform_1(%arg0: i32) -> (i32, i32, i32) {
    %c0_i32 = arith.constant 0 : i32
    %c0_i32_0 = arith.constant 0 : i32
    %c0_i32_1 = arith.constant 0 : i32
    return %arg0, %c0_i32, %c0_i32_0 : i32, i32, i32
  }
}

</mosaic_0001>

<bundles_post_ra>
// kernel: tpu_custom_call.1
= control target key start
LH: loop header
LB: loop body
LE: loop exit
PB: predicated region body
PF: predicated region fallthrough
CT: control target
= control target key end

     0   :  { %6 = vsyncpa [#allocation3], 0  ;;  %s1068_s0 = inlined_call_operand.hbm [shape: f32[3,3,4096], index: 0, kind: input, shape index: {}]   ;;  %s1069_s1 = inlined_call_operand.hbm [shape: bf16[3,3,4096], index: 1, kind: output, shape index: {}]  }
   0x1   :  { %8 = vsyncpa [#allocation3 + $0x1], 0 }
   0x2   :  { %9 = vsyncpa [#allocation4], 0 }
   0x3   :  { %11 = vsyncpa [#allocation4 + $0x1], 0  ;;  %s779_s6 = smov 0   ;;  %s781_s7 = smov 0  }
   0x4   :  { %s783_s8 = smov 0   ;;  %s785_s9 = smov 0  }
   0x5 LB: > { %s800_s10 = sadd.s32 4294967295, %s761_s9   ;;  %s587_s11 = sadd.s32 4294967294, %s761_s9   ;;  %s761_s9 = sphi %s785_s9, %s1093_s9   ;;  %s757_s8 = sphi %s783_s8, %s1092_s8   ;;  %s753_s7 = sphi %s781_s7, %s1091_s7   ;;  %s749_s6 = sphi %s779_s6, %s1090_s6  }
   0x6   : > { %s804_s12 = sadd.s32 1, %s761_s9   ;;  %s24_s13 = sadd.s32 1, %s757_s8 }
   0x7   : > { %s21_s14 = ssub.s32 %s761_s9, %s804_s12  ;;  %p31_p0 = scmp.ne.s32.totalorder %s757_s8, %s753_s7 }
   0x8   : > { %p22_p1 = scmp.eq.s32.totalorder %s21_s14, 0  ;;  %p32_p2 = scmp.eq.s32.totalorder %s761_s9, 0 }
   0x9   : > { %p37_p3 = scmp.ne.s32.totalorder %s753_s7, %s749_s6  ;;  %p38_p4 = scmp.eq.s32.totalorder %s800_s10, 0 }
   0xa   : > { %s816_s15 = scalar_select %p22_p1, %s757_s8, %s24_s13  }
   0xb   : > { %p818_p5 = por %p32_p2, %p31_p0  ;;  %p822_p6 = por %p38_p4, %p37_p3 }
   0xc   : > { %p61_p7 = scmp.eq.s32.totalorder %s800_s10, 2  ;;  %p67_p8 = scmp.eq.s32.totalorder %s587_s11, 2 }
   0xd   : > { %s1073_s17 = scalar_select %p822_p6, 1, 0 }
   0xe   : > { %p631_p9 = scmp.lt.s32.totalorder %s761_s9, 3  ;;  %p828_p10 = por %p61_p7, %p31_p0 }
   0xf   : > { %p832_p11 = por %p67_p8, %p37_p3  ;;  %s87_s20 = sand.u32 1, %s757_s8  }
  0x10   : > { %s1074_s18 = scalar_select %p828_p10, 1, 0 }
  0x11   : > { %s1075_s19 = scalar_select %p832_p11, 1, 0 }
  0x12   : > { %s617_s21 = sshll.u32 %s761_s9, 11  ;;  %s590_s22 = sshll.u32 %s87_s20, 7 }
  0x13   : > { %s841_s25 = scalar_lea.hbm %s1068_s0, %s617_s21  ;;  %s91_s26 = scalar_lea.vmem [#allocation2], %s590_s22 }
  0x14   : > { %s99_s27 = sshll.u32 %s91_s26, 4  ;;  %p845_p12 = pnand %p631_p9, %p818_p5  ;;  %s849_s27 = int_to_ptr.vmem [resolvable:$true] %s99_s27 }
  0x15   : > { %s88_s29 = scalar_lea.sflag [#allocation3], %s87_s20  ;;  %s669_s30 = scalar_lea.hbm %s841_s25, 2048 }
  0x16   : > { %p670_p1 = scmp.ne.s32.totalorder %s841_s25, %s669_s30  ;;  %p671_p2 = pneg %p845_p12 }
  0x17   : > { %s674_s4 = scalar_lea.hbm %s1068_s0, 6144  ;;  %p675_p5 = scmp.lt.s32.totalorder %s841_s25, %s1068_s0 }
  0x18   : > { %p672_p3 = pnand %p671_p2, %p670_p1  ;;  %p676_p7 = scmp.lt.s32.totalorder %s674_s4, %s669_s30 }
  0x1a   : > { %p673_p4 = pneg %p672_p3  ;;  %p677_p8 = por %p676_p7, %p675_p5 }
  0x1c   : > { %p678_p9 = pnand %p677_p8, %p673_p4 }
  0x1e   : > { %681 = shalt.err (!%p678_p9)
}
  0x1f   : > { %s682_s13 = scalar_lea.vmem %s849_s27, 2048  ;;  %s763_s14 = smov [#allocation2]  }
  0x20   : > { %p683_p13 = scmp.ne.s32.totalorder %s849_s27, %s682_s13  ;;  %s687_s16 = sshll.u32 %s763_s14, 4  ;;  %s688_s16 = int_to_ptr.vmem [resolvable:$false] %s687_s16 }
  0x21   : > { %s689_s20 = scalar_lea.vmem %s688_s16, 4096  ;;  %p690_p3 = scmp.lt.s32.totalorder %s849_s27, %s688_s16 }
  0x22   : > { %p685_p0 = pnand %p683_p13, %p671_p2  ;;  %p691_p11 = scmp.lt.s32.totalorder %s689_s20, %s682_s13 }
  0x24   : > { %p686_p1 = pneg %p685_p0  ;;  %p692_p10 = por %p691_p11, %p690_p3 }
  0x26   : > { %p693_p6 = pnand %p692_p10, %p686_p1 }
  0x28   : > { %696 = shalt.err (!%p693_p6)
}
  0x29   : > { %626 = dma.hbm_to_vmem [thread:$0]  (!%p845_p12), %s841_s25, 2048, %s849_s27, %s88_s29  }
  0x2a   : > { %p1077_p4 = scmp.lt.s32.totalorder %s761_s9, 4  ;;  %p1078_p5 = scmp.ge.s32.totalorder %s761_s9, 1 }
  0x2c   : > { %p105_p13 = pnand %p1078_p5, %p1077_p4 }
  0x2d   : > { %s876_s21 = sand.u32 (!%p105_p13), 1, %s753_s7   ;;  %p1079_p6 = scmp.ne.s32.totalorder (!%p105_p13), %s1073_s17, 0 }
  0x2e   : > { %108 = sbr.rel (%p105_p13) target bundleno = 103 (0x67), region = 24  ;;  %s594_s22 = sshll.u32 (!%p105_p13), %s876_s21, 7 }
  0x2f   : > { %s111_s23 = scalar_lea.sflag (!%p105_p13), [#allocation3], %s876_s21  ;;  %s880_s24 = scalar_lea.vmem (!%p105_p13), [#allocation2], %s594_s22 }
  0x33   : > { %740 = dma.done.wait (%p1079_p6), %s111_s23, 2048  }
  0x34   : > { %742 = vsyncadd (%p1079_p6), %s111_s23, 4294965248  ;;  %v149_v0 = vlaneseq  ;;  %v764_v2 = vmov 839922192   ;;  %v765_v4 = vmov 1983009808   ;;  %vm463_vm0 = vcmask 1041408  }
  0x35   : > { %v159_v3 = vunpack.c.l.s4 %v764_v2  ;;  %v322_v5 = vunpack.c.l.s4 %v765_v4  ;;  %vm464_vm1 = vsmask.f32 1280  ;;  %vm466_vm4 = vcmask 1043458   ;;  %v133_v14 = vld [vmem:[%s880_s24] sm:$0x77]  ;;  %s595_s17 = sshll.u32 %s876_s21, 6 }
  0x36   : > { %v150_v1 = vshrl.u32 %v149_v0, 7  ;;  %v766_v7 = vmov 0.406   ;;  %v767_v9 = vmov 4.4444447   ;;  %vm890_vm6 = vmand %vm463_vm0, %vm464_vm1  ;;  %vm470_vm8 = vcmask 1045508  }
  0x37   : > { %v160_v6 = vunpack.c.0.s8 %v159_v3  ;;  %vm467_vm5 = vsmask.f32 3328  ;;  %v134_v15 = vld [vmem:[%s880_s24 + $0x8] sm:$0x77]  ;;  %v323_v16 = vunpack.c.0.s8 %v322_v5  ;;  %v135_v21 = vld [vmem:[%s880_s24 + $0x10] sm:$0x77] }
  0x38   : > { %vm151_vm2 = vcmp.eq.s32.totalorder %v150_v1, 0  ;;  %vm152_vm3 = vcmp.eq.s32.totalorder %v150_v1, 1  ;;  %vm899_vm7 = vmand %vm466_vm4, %vm467_vm5  ;;  %vm471_vm9 = vsmask.f32 5376  ;;  %vm474_vm10 = vcmask 1047558   ;;  %s960_s25 = scalar_lea.vmem [#allocation5], %s595_s17 }
  0x39   : > { %v153_v8 = vsel %vm152_vm3, 0.456, %v766_v7  ;;  %v155_v10 = vsel %vm152_vm3, 4.464286, %v767_v9  ;;  %v163_v13 = vsub.s32 %v160_v6, %v150_v1  ;;  %v136_v22 = vld [vmem:[%s880_s24 + $0x18] sm:$0x77]  ;;  %v911_v29 = vsub.s32 %v323_v16, %v150_v1  ;;  %vm469_vm11 = vmor %vm899_vm7, %vm890_vm6 }
  0x3a   : > { %v154_v11 = vsel %vm151_vm2, 0.485, %v153_v8  ;;  %v156_v12 = vsel %vm151_vm2, 4.366812, %v155_v10  ;;  %v137_v27 = vld [vmem:[%s880_s24 + $0x20] sm:$0x77]  ;;  %vm472_vm13 = vmand %vm470_vm8, %vm471_vm9 }
  0x3b   : > { %v894_v18 = vrot.slane %v154_v11, %v163_v13  ;;  %v896_v19 = vrot.slane %v156_v12, %v163_v13  ;;  %v138_v28 = vld [vmem:[%s880_s24 + $0x28] sm:$0x77]  ;;  %vm475_vm12 = vsmask.f32 7424  ;;  %v139_v32 = vld [vmem:[%s880_s24 + $0x30] sm:$0x77]  ;;  %vm937_vm14 = vmor %vm472_vm13, %vm469_vm11 }
  0x3c   : > { %v140_v33 = vld [vmem:[%s880_s24 + $0x38] sm:$0x77]  ;;  %vm476_vm15 = vmand %vm474_vm10, %vm475_vm12  ;;  %v141_v59 = vld [vmem:[%s880_s24 + $0x40] sm:$0x77]  ;;  %s618_s26 = sshll.u32 %s800_s10, 10  ;;  %s517_s27 = sshll.u32 %s960_s25, 4  ;;  %s518_s27 = int_to_ptr.vmem [resolvable:$true] %s517_s27 }
  0x3d   : > { %v166_v23 = vsub.f32 %v133_v14, %v894_v18  ;;  %v167_v24 = vsub.f32 %v134_v15, %v894_v18  ;;  %v168_v25 = vsub.f32 %v135_v21, %v894_v18  ;;  %v169_v26 = vsub.f32 %v136_v22, %v894_v18  ;;  %v142_v60 = vld [vmem:[%s880_s24 + $0x48] sm:$0x77]  ;;  %v143_v1 = vld [vmem:[%s880_s24 + $0x50] sm:$0x77]  ;;  %vm954_vm0 = vmor %vm476_vm15, %vm937_vm14  ;;  %s1029_s30 = scalar_lea.hbm %s1069_s1, %s618_s26  ;;  %s503_s2 = scalar_lea.sflag [#allocation4], %s876_s21 }
  0x3e   : > { %v170_v30 = vsub.f32 %v137_v27, %v894_v18  ;;  %v171_v31 = vsub.f32 %v138_v28, %v894_v18  ;;  %v172_v40 = vsub.f32 %v139_v32, %v894_v18  ;;  %v173_v41 = vsub.f32 %v140_v33, %v894_v18  ;;  %v478_v3 = vld [vmem:[%s960_s25] sm:$0xff]  ;;  %v481_v4 = vld [vmem:[%s960_s25 + $0x8] sm:$0xff]  ;;  %v484_v11 = vld [vmem:[%s960_s25 + $0x10] sm:$0xff]  ;;  %s697_s10 = scalar_lea.vmem %s518_s27, 1024  ;;  %p1088_p11 = scmp.ne.s32.totalorder %s1074_s18, 0 }
  0x3f   : > { %v191_v34 = vmul.f32 %v896_v19, %v166_v23  ;;  %v192_v35 = vmul.f32 %v896_v19, %v167_v24  ;;  %v193_v36 = vmul.f32 %v896_v19, %v168_v25  ;;  %v194_v37 = vmul.f32 %v896_v19, %v169_v26  ;;  %v144_v14 = vld [vmem:[%s880_s24 + $0x58] sm:$0x77]  ;;  %v145_v21 = vld [vmem:[%s880_s24 + $0x60] sm:$0x77]  ;;  %v146_v22 = vld [vmem:[%s880_s24 + $0x68] sm:$0x77]  ;;  %p698_p10 = scmp.ne.s32.totalorder %s518_s27, %s697_s10 }
  0x40   : > { %v195_v38 = vmul.f32 %v896_v19, %v170_v30  ;;  %v196_v39 = vmul.f32 %v896_v19, %v171_v31  ;;  %v197_v49 = vmul.f32 %v896_v19, %v172_v40  ;;  %v198_v50 = vmul.f32 %v896_v19, %v173_v41  ;;  %v487_v25 = vld [vmem:[%s960_s25 + $0x18] sm:$0xff]  ;;  %v147_v28 = vld [vmem:[%s880_s24 + $0x70] sm:$0x77]  ;;  %s768_s3 = smov [#allocation5]  }
  0x41   : > { %v223_v42 = vcombine.high %v191_v34, %v191_v34  ;;  %v224_v43 = vcombine.high %v192_v35, %v192_v35  ;;  %v225_v44 = vcombine.high %v193_v36, %v193_v36  ;;  %v226_v45 = vcombine.high %v194_v37, %v194_v37  ;;  %p699_p12 = pnand %p698_p10, %p1088_p11  ;;  %s701_s4 = sshll.u32 %s768_s3, 4  ;;  %s702_s4 = int_to_ptr.vmem [resolvable:$false] %s701_s4 }
  0x42   : > { %v227_v47 = vcombine.high %v195_v38, %v195_v38  ;;  %v228_v48 = vcombine.high %v196_v39, %v196_v39  ;;  %v229_v57 = vcombine.high %v197_v49, %v197_v49  ;;  %v230_v58 = vcombine.high %v198_v50, %v198_v50  ;;  %s703_s5 = scalar_lea.vmem %s702_s4, 2048  ;;  %p704_p2 = scmp.lt.s32.totalorder %s518_s27, %s702_s4 }
  0x43   : > { %v596_v51 = vpack.c.bf16 %v223_v42, %v191_v34  ;;  %v597_v52 = vpack.c.bf16 %v224_v43, %v192_v35  ;;  %v598_v53 = vpack.c.bf16 %v225_v44, %v193_v36  ;;  %v599_v54 = vpack.c.bf16 %v226_v45, %v194_v37  ;;  %p700_p0 = pneg %p699_p12  ;;  %p705_p7 = scmp.lt.s32.totalorder %s703_s5, %s697_s10 }
  0x44   : > { %v600_v55 = vpack.c.bf16 %v227_v47, %v195_v38  ;;  %v601_v56 = vpack.c.bf16 %v228_v48, %v196_v39  ;;  %v602_v7 = vpack.c.bf16 %v229_v57, %v197_v49  ;;  %v603_v8 = vpack.c.bf16 %v230_v58, %v198_v50  ;;  %v148_v38 = vld [vmem:[%s880_s24 + $0x78] sm:$0x77] }
  0x45   : > { %v327_v61 = vrot.slane %v596_v51, %v911_v29  ;;  %v334_v62 = vrot.slane %v597_v52, %v911_v29  ;;  %v344_v63 = vrot.slane %v598_v53, %v911_v29  ;;  %v351_v0 = vrot.slane %v599_v54, %v911_v29  ;;  %p706_p8 = por %p705_p7, %p704_p2 }
  0x46   : > { %v361_v5 = vrot.slane %v600_v55, %v911_v29  ;;  %v368_v6 = vrot.slane %v601_v56, %v911_v29  ;;  %v174_v12 = vsub.f32 %v141_v59, %v894_v18  ;;  %v175_v13 = vsub.f32 %v142_v60, %v894_v18  ;;  %v490_v55 = vld [vmem:[%s960_s25 + $0x20] sm:$0xff] }
  0x47   : > { %v335_v9 = vcombine.low %v327_v61, %v334_v62  ;;  %v352_v10 = vcombine.low %v344_v63, %v351_v0  ;;  %v378_v16 = vrot.slane %v602_v7, %v911_v29  ;;  %v385_v17 = vrot.slane %v603_v8, %v911_v29  ;;  %p707_p9 = pnand %p706_p8, %p700_p0 }
  0x48   : > { %v369_v15 = vcombine.low %v361_v5, %v368_v6  ;;  %v176_v20 = vsub.f32 %v143_v1, %v894_v18  ;;  %v199_v26 = vmul.f32 %v896_v19, %v174_v12  ;;  %v200_v27 = vmul.f32 %v896_v19, %v175_v13  ;;  %v496_v6 = vld [vmem:[%s960_s25 + $0x30] sm:$0xff]  ;;  %v499_v13 = vld [vmem:[%s960_s25 + $0x38] sm:$0xff] }
  0x49   : > { %v479_v23 = vsel %vm954_vm0, %v335_v9, %v478_v3  ;;  %v482_v24 = vsel %vm954_vm0, %v352_v10, %v481_v4  ;;  %v386_v31 = vcombine.low %v378_v16, %v385_v17  ;;  %v177_v32 = vsub.f32 %v144_v14, %v894_v18  ;;  %v493_v3 = vld [vmem:[%s960_s25 + $0x28] sm:$0xff] }
  0x4a   : > { %480 = vst [vmem:[%s960_s25] sm:$0xff] %v479_v23  ;;  %483 = vst [vmem:[%s960_s25 + $0x8] sm:$0xff] %v482_v24  ;;  %v485_v30 = vsel %vm954_vm0, %v369_v15, %v484_v11  ;;  %v201_v33 = vmul.f32 %v896_v19, %v176_v20  ;;  %v231_v34 = vcombine.high %v199_v26, %v199_v26 }
  0x4b   : > { %486 = vst [vmem:[%s960_s25 + $0x10] sm:$0xff] %v485_v30  ;;  %v232_v35 = vcombine.high %v200_v27, %v200_v27  ;;  %v178_v36 = vsub.f32 %v145_v21, %v894_v18  ;;  %v179_v37 = vsub.f32 %v146_v22, %v894_v18  ;;  %v488_v39 = vsel %vm954_vm0, %v386_v31, %v487_v25 }
  0x4c   : > { %v202_v40 = vmul.f32 %v896_v19, %v177_v32  ;;  %v233_v41 = vcombine.high %v201_v33, %v201_v33  ;;  %v180_v42 = vsub.f32 %v147_v28, %v894_v18  ;;  %489 = vst [vmem:[%s960_s25 + $0x18] sm:$0xff] %v488_v39  ;;  %v604_v43 = vpack.c.bf16 %v231_v34, %v199_v26 }
  0x4d   : > { %v605_v44 = vpack.c.bf16 %v232_v35, %v200_v27  ;;  %v203_v45 = vmul.f32 %v896_v19, %v178_v36  ;;  %v204_v46 = vmul.f32 %v896_v19, %v179_v37  ;;  %v181_v49 = vsub.f32 %v148_v38, %v894_v18 }
  0x4e   : > { %v234_v47 = vcombine.high %v202_v40, %v202_v40  ;;  %v606_v48 = vpack.c.bf16 %v233_v41, %v201_v33  ;;  %v205_v50 = vmul.f32 %v896_v19, %v180_v42  ;;  %v395_v51 = vrot.slane %v604_v43, %v911_v29 }
  0x4f   : > { %v402_v52 = vrot.slane %v605_v44, %v911_v29  ;;  %v235_v53 = vcombine.high %v203_v45, %v203_v45  ;;  %v236_v54 = vcombine.high %v204_v46, %v204_v46  ;;  %v206_v58 = vmul.f32 %v896_v19, %v181_v49 }
  0x50   : > { %v607_v56 = vpack.c.bf16 %v234_v47, %v202_v40  ;;  %v412_v57 = vrot.slane %v606_v48, %v911_v29  ;;  %v237_v59 = vcombine.high %v205_v50, %v205_v50 }
  0x51   : > { %v403_v60 = vcombine.low %v395_v51, %v402_v52  ;;  %v608_v18 = vpack.c.bf16 %v235_v53, %v203_v45  ;;  %v609_v61 = vpack.c.bf16 %v236_v54, %v204_v46  ;;  %v238_v63 = vcombine.high %v206_v58, %v206_v58 }
  0x52   : > { %v419_v62 = vrot.slane %v607_v56, %v911_v29  ;;  %v610_v0 = vpack.c.bf16 %v237_v59, %v205_v50 }
  0x53   : > { %v491_v1 = vsel %vm954_vm0, %v403_v60, %v490_v55  ;;  %v429_v4 = vrot.slane %v608_v18, %v911_v29  ;;  %v436_v19 = vrot.slane %v609_v61, %v911_v29  ;;  %v611_v7 = vpack.c.bf16 %v238_v63, %v206_v58 }
  0x54   : > { %492 = vst [vmem:[%s960_s25 + $0x20] sm:$0xff] %v491_v1  ;;  %v420_v5 = vcombine.low %v412_v57, %v419_v62  ;;  %v446_v8 = vrot.slane %v610_v0, %v911_v29 }
  0x55   : > { %v437_v9 = vcombine.low %v429_v4, %v436_v19  ;;  %v453_v11 = vrot.slane %v611_v7, %v911_v29 }
  0x56   : > { %v494_v10 = vsel %vm954_vm0, %v420_v5, %v493_v3 }
  0x57   : > { %495 = vst [vmem:[%s960_s25 + $0x28] sm:$0xff] %v494_v10  ;;  %v497_v12 = vsel %vm954_vm0, %v437_v9, %v496_v6  ;;  %v454_v14 = vcombine.low %v446_v8, %v453_v11 }
  0x58   : > { %498 = vst [vmem:[%s960_s25 + $0x30] sm:$0xff] %v497_v12 }
  0x59   : > { %v500_v15 = vsel %vm954_vm0, %v454_v14, %v499_v13 }
  0x5a   : > { %501 = vst [vmem:[%s960_s25 + $0x38] sm:$0xff] %v500_v15 }
  0x5b   : > { %710 = shalt.err (!%p707_p9)
}
  0x5c   : > { %s711_s11 = scalar_lea.hbm %s1029_s30, 1024  ;;  %s715_s16 = scalar_lea.hbm %s1069_s1, 3072 }
  0x5d   : > { %p712_p1 = scmp.ne.s32.totalorder %s1029_s30, %s711_s11  ;;  %p716_p5 = scmp.lt.s32.totalorder %s1029_s30, %s1069_s1 }
  0x5e   : > { %p717_p13 = scmp.lt.s32.totalorder %s715_s16, %s711_s11 }
  0x5f   : > { %p713_p3 = pnand %p712_p1, %p1088_p11 }
  0x60   : > { %p718_p6 = por %p717_p13, %p716_p5 }
  0x61   : > { %p714_p4 = pneg %p713_p3 }
  0x63   : > { %p719_p10 = pnand %p718_p6, %p714_p4 }
  0x65   : > { %722 = shalt.err (!%p719_p10)
}
  0x66   : > { %621 = dma.vmem_to_hbm [thread:$0]  (%p1088_p11), %s518_s27, 1024, %s1029_s30, %s503_s2  }
  0x67 PF: > { %p632_p12 = scmp.ge.s32.totalorder %s761_s9, 2  ;;  %s529_s22 = sand.u32 1, %s749_s6  }
  0x68   : > { %p1089_p0 = scmp.ne.s32.totalorder %s1075_s19, 0  ;;  %s530_s23 = scalar_lea.sflag [#allocation4], %s529_s22 }
  0x6a   : > { %p628_p2 = pnand %p632_p12, %p1089_p0 }
  0x6c   : > { %p629_p7 = pneg %p628_p2 }
  0x6e   : > { %744 = dma.done.wait (%p629_p7), %s530_s23, 1024  }
  0x6f   : > { %746 = vsyncadd (%p629_p7), %s530_s23, 4294966272  ;;  %p14_p8 = scmp.ge.s32.totalorder %s804_s12, 5   ;;  %s1090_s6 = smov %s753_s7 }
  0x70   : > { %s1091_s7 = smov %s757_s8  ;;  %s1092_s8 = smov %s816_s15 }
  0x71   : > { %s1093_s9 = smov %s804_s12  ;;  %16 = sbr.rel (!%p14_p8) target bundleno = 5 (0x5), region = 69 }
  0x76   :  { %535 = vsyncpa [#allocation3], 1 }
  0x77   :  { %537 = vsyncpa [#allocation3 + $0x1], 1 }
  0x78   :  { %538 = vsyncpa [#allocation4], 1 }
  0x79   :  { %540 = vsyncpa [#allocation4 + $0x1], 1 }

</bundles_post_ra>
